<compile_context>
chip_gen: v5e
topology: v5e:2x2
jax: 0.10.0
libtpu: 0.0.40
codegen_flags: <defaults>
</compile_context>

<pallas_src>
import jax
import jax.numpy as jnp
from jax.experimental import pallas as pl
from jax.experimental.pallas import tpu as pltpu


def _round_up(x, m):
    return (x + m - 1) // m * m


def _make_embed_kernel(n_layers, n_heads):
    """Fused MLP (Linear+ReLU per layer) + per-head Linear for one row tile."""

    def kernel(*refs):
        x_ref = refs[0]
        enc_params = refs[1:1 + 2 * n_layers]
        head_params = refs[1 + 2 * n_layers:1 + 2 * (n_layers + n_heads)]
        outs = refs[1 + 2 * (n_layers + n_heads):]
        enc_ref, head_refs = outs[0], outs[1:]

        # Encoder: cast to bf16 only at the MXU boundary, accumulate in f32.
        h = x_ref[...]                                    # (tm, D_in) f32
        for i in range(n_layers):
            w_ref, b_ref = enc_params[2 * i], enc_params[2 * i + 1]
            z = jnp.dot(h.astype(w_ref.dtype), w_ref[...],
                        preferred_element_type=jnp.float32)
            h = jnp.maximum(z + b_ref[...], 0.0)          # f32 epilogue
        enc_ref[...] = h.astype(enc_ref.dtype)

        # Heads: each written directly at its true lane width.
        h_bf = h.astype(jnp.bfloat16)
        for j in range(n_heads):
            w_ref, b_ref = head_params[2 * j], head_params[2 * j + 1]
            y = jnp.dot(h_bf, w_ref[...], preferred_element_type=jnp.float32)
            head_refs[j][...] = (y + b_ref[...]).astype(head_refs[j].dtype)

    return kernel


def pack_params(params):
    """One-time packing of module parameters (hoisted out of the call path).

    Weights -> bf16 (MXU operands), biases -> f32 (1, out)."""
    layers = []
    i = 1
    while f"w{i}" in params:
        layers.append((params[f"w{i}"].astype(jnp.bfloat16),
                       params[f"b{i}"].astype(jnp.float32)))
        i += 1
    heads = [(w.astype(jnp.bfloat16), b.astype(jnp.float32))
             for (w, b) in params["heads"]]
    return {"layers": layers, "heads": heads}


def embed_forward(x, packed, *, tm=None, out_dtype=jnp.float32):
    """Embed forward pass as a single fused Pallas kernel.

    x:      (N, D_in) float32
    packed: output of pack_params()
    Returns (enc, [head_outputs...]) matching PyTorch `(x, xs)`.
    """
    N, D_in = x.shape
    layers, heads = packed["layers"], packed["heads"]
    n_layers, n_heads = len(layers), len(heads)
    H_last = layers[-1][0].shape[1]
    out_dims = [w.shape[1] for (w, _) in heads]

    # ---- row tile: big tiles amortize per-step cost; no N padding ----
    if tm is None:
        tm = 1024
    tm = int(tm)
    if tm >= N:
        tm = N                                       # single full-batch block
    else:
        tm = max(8, _round_up(min(tm, N), 8))        # sublane-aligned tile
        if tm >= N:
            tm = N
    grid = (pl.cdiv(N, tm),)                         # natural short last tile

    row = lambda i: (i, 0)
    const = lambda i: (0, 0)                         # resident weights/biases

    in_specs = [pl.BlockSpec((tm, D_in), row)]       # x streamed, unpadded f32
    args = [x]
    for (w, b) in layers + heads:
        in_specs.append(pl.BlockSpec(w.shape, const))
        in_specs.append(pl.BlockSpec(b.shape, const))
        args.extend([w, b])

    out_shape = tuple(
        [jax.ShapeDtypeStruct((N, H_last), out_dtype)]
        + [jax.ShapeDtypeStruct((N, d), out_dtype) for d in out_dims])
    out_specs = tuple(
        [pl.BlockSpec((tm, H_last), row)]
        + [pl.BlockSpec((tm, d), row) for d in out_dims])

    # ---- advisory cost estimate ----
    out_itemsize = jnp.dtype(out_dtype).itemsize
    flops = 0
    prev = D_in
    for (w, _) in layers:
        flops += 2 * N * prev * w.shape[1]
        prev = w.shape[1]
    flops += 2 * N * H_last * sum(out_dims)
    param_bytes = sum(int(w.size) * 2 + int(b.size) * 4
                      for (w, b) in layers + heads)
    bytes_accessed = (4 * N * D_in + param_bytes
                      + out_itemsize * N * (H_last + sum(out_dims)))
    cost = pl.CostEstimate(flops=int(flops), transcendentals=0,
                           bytes_accessed=int(bytes_accessed))

    # ---- right-size the VMEM request from the actual tile footprint ----
    tile_io = (tm * D_in * 4 + tm * H_last * out_itemsize
               + sum(tm * d * out_itemsize for d in out_dims))
    max_width = max([D_in, H_last] + [w.shape[1] for (w, _) in layers])
    interm = tm * (2 * max_width + max(out_dims)) * 4      # f32 intermediates
    vmem_need = 2 * (tile_io + param_bytes) + interm + (2 << 20)
    vmem_limit = int(min(max(vmem_need, 16 << 20), 64 << 20))

    compiler_params = pltpu.CompilerParams(
        dimension_semantics=("parallel",),     # row axis shards across v7x TCs
        vmem_limit_bytes=vmem_limit,
    )

    outs = pl.pallas_call(
        _make_embed_kernel(n_layers, n_heads),
        out_shape=out_shape,
        grid=grid,
        in_specs=in_specs,
        out_specs=out_specs,
        compiler_params=compiler_params,
        cost_estimate=cost,
    )(*args)

    enc, head_outs = outs[0], list(outs[1:])
    return enc, head_outs


def init_params(key, d_in, hidden_dims, output_dims):
    """Deterministic synthetic parameter init (shapes follow Embed.__init__)."""
    dims = [d_in] + list(hidden_dims)
    params = {}
    k = key
    for i in range(1, len(dims)):
        k, k_w, k_b = jax.random.split(k, 3)
        scale = 1.0 / jnp.sqrt(jnp.float32(dims[i - 1]))
        params[f"w{i}"] = jax.random.uniform(
            k_w, (dims[i - 1], dims[i]), jnp.float32, -1.0, 1.0) * scale
        params[f"b{i}"] = jax.random.uniform(
            k_b, (1, dims[i]), jnp.float32, -1.0, 1.0) * scale
    heads = []
    last = dims[-1]
    for out_dim in output_dims:
        k, k_w, k_b = jax.random.split(k, 3)
        scale = 1.0 / jnp.sqrt(jnp.float32(last))
        wh = jax.random.uniform(k_w, (last, out_dim), jnp.float32,
                                -1.0, 1.0) * scale
        bh = jax.random.uniform(k_b, (1, out_dim), jnp.float32,
                                -1.0, 1.0) * scale
        heads.append((wh, bh))
    params["heads"] = heads
    return params


def embed_ref(x, params):
    """Pure-JAX f32 reference of the PyTorch forward."""
    h = x
    i = 1
    while f"w{i}" in params:
        h = jnp.maximum(h @ params[f"w{i}"] + params[f"b{i}"], 0.0)
        i += 1
    return h, [h @ wh + bh for (wh, bh) in params["heads"]]


if __name__ == "__main__":
    # Small shapes consistent with the module:
    observation_size = 6
    action_size = 2
    batch_size = 4                      # module's "batch_size" folds into D_in
    d_in = (observation_size + action_size) * batch_size   # 32
    hidden_dims = [128, 128]
    output_dims = [32, 16]              # two heads -> exercises multi-head path
    N = 256                             # rows fed to forward()

    key = jax.random.PRNGKey(0)
    k_x, k_p = jax.random.split(key)
    x = jax.random.normal(k_x, (N, d_in), jnp.float32)
    params = init_params(k_p, d_in, hidden_dims, output_dims)
    packed = pack_params(params)        # one-time weight packing (bf16 cast)

    # Default tiling: tm clamps to N -> single full-batch step (best for tiny N).
    enc, head_outs = embed_forward(x, packed)
    enc = jax.block_until_ready(enc)
    head_outs = [jax.block_until_ready(h) for h in head_outs]

    # Correctness against pure-JAX f32 reference
    # (tolerance loosened for bf16 MXU operands).
    enc_ref_v, head_ref_v = embed_ref(x, params)
    assert enc.shape == (N, hidden_dims[-1])
    for h, d in zip(head_outs, output_dims):
        assert h.shape == (N, d)
    assert jnp.allclose(enc, enc_ref_v, atol=5e-2, rtol=5e-2)
    for h, hr in zip(head_outs, head_ref_v):
        assert jnp.allclose(h, hr, atol=5e-2, rtol=5e-2)

    # Also exercise the multi-step grid with a natural short last tile
    # (cdiv path, no row padding / no [:N] slices).
    enc2, head_outs2 = embed_forward(x, packed, tm=96)   # grid=(3,), last tile=64
    enc2 = jax.block_until_ready(enc2)
    head_outs2 = [jax.block_until_ready(h) for h in head_outs2]
    assert jnp.allclose(enc2, enc_ref_v, atol=5e-2, rtol=5e-2)
    for h, hr in zip(head_outs2, head_ref_v):
        assert jnp.allclose(h, hr, atol=5e-2, rtol=5e-2)

    print("KERNEL_OK")
</pallas_src>

<mosaic_0001>
module attributes {stable_mosaic.version = 11 : i64} {
  func.func @kernel(%arg0: i32, %arg1: memref<256x32xf32, #tpu.memory_space<vmem>>, %arg2: memref<32x128xbf16, #tpu.memory_space<vmem>>, %arg3: memref<1x128xf32, #tpu.memory_space<vmem>>, %arg4: memref<128x128xbf16, #tpu.memory_space<vmem>>, %arg5: memref<1x128xf32, #tpu.memory_space<vmem>>, %arg6: memref<128x32xbf16, #tpu.memory_space<vmem>>, %arg7: memref<1x32xf32, #tpu.memory_space<vmem>>, %arg8: memref<128x16xbf16, #tpu.memory_space<vmem>>, %arg9: memref<1x16xf32, #tpu.memory_space<vmem>>, %arg10: memref<256x128xf32, #tpu.memory_space<vmem>>, %arg11: memref<256x32xf32, #tpu.memory_space<vmem>>, %arg12: memref<256x16xf32, #tpu.memory_space<vmem>>) attributes {dimension_semantics = [#tpu.dimension_semantics<parallel>], iteration_bounds = array<i64: 1>, scalar_prefetch = 0 : i64, scratch_operands = 0 : i64, tpu.core_type = #tpu.core_type<tc>, window_params = [{transform_indices = @transform_0, window_bounds = array<i64: 256, 32>}, {pipeline_mode = #tpu.pipeline_mode<synchronous>, transform_indices = @transform_1, window_bounds = array<i64: 32, 128>}, {pipeline_mode = #tpu.pipeline_mode<synchronous>, transform_indices = @transform_2, window_bounds = array<i64: 1, 128>}, {pipeline_mode = #tpu.pipeline_mode<synchronous>, transform_indices = @transform_3, window_bounds = array<i64: 128, 128>}, {pipeline_mode = #tpu.pipeline_mode<synchronous>, transform_indices = @transform_4, window_bounds = array<i64: 1, 128>}, {pipeline_mode = #tpu.pipeline_mode<synchronous>, transform_indices = @transform_5, window_bounds = array<i64: 128, 32>}, {pipeline_mode = #tpu.pipeline_mode<synchronous>, transform_indices = @transform_6, window_bounds = array<i64: 1, 32>}, {pipeline_mode = #tpu.pipeline_mode<synchronous>, transform_indices = @transform_7, window_bounds = array<i64: 128, 16>}, {pipeline_mode = #tpu.pipeline_mode<synchronous>, transform_indices = @transform_8, window_bounds = array<i64: 1, 16>}, {transform_indices = @transform_9, window_bounds = array<i64: 256, 128>}, {transform_indices = @transform_10, window_bounds = array<i64: 256, 32>}, {transform_indices = @transform_11, window_bounds = array<i64: 256, 16>}]} {
    %c0 = arith.constant 0 : index
    %c0_0 = arith.constant 0 : index
    %0 = vector.load %arg1[%c0, %c0_0] : memref<256x32xf32, #tpu.memory_space<vmem>>, vector<256x32xf32>
    %1 = arith.truncf %0 : vector<256x32xf32> to vector<256x32xbf16>
    %c0_1 = arith.constant 0 : index
    %c0_2 = arith.constant 0 : index
    %2 = vector.load %arg2[%c0_1, %c0_2] : memref<32x128xbf16, #tpu.memory_space<vmem>>, vector<32x128xbf16>
    %cst = arith.constant dense<0.000000e+00> : vector<256x128xf32>
    %3 = tpu.matmul %1, %2, %cst {dimension_numbers = #tpu.dot_dimension_numbers<[1], [0], [0], [1], [0, 0, 1, 1], [], []>} : vector<256x32xbf16>, vector<32x128xbf16>, vector<256x128xf32> -> vector<256x128xf32>
    %c0_3 = arith.constant 0 : index
    %c0_4 = arith.constant 0 : index
    %4 = vector.load %arg3[%c0_3, %c0_4] : memref<1x128xf32, #tpu.memory_space<vmem>>, vector<1x128xf32>
    %5 = vector.broadcast %4 : vector<1x128xf32> to vector<256x128xf32>
    %6 = arith.addf %3, %5 : vector<256x128xf32>
    %cst_5 = arith.constant 0.000000e+00 : f32
    %7 = vector.broadcast %cst_5 : f32 to vector<256x128xf32>
    %8 = arith.maximumf %6, %7 : vector<256x128xf32>
    %9 = arith.truncf %8 : vector<256x128xf32> to vector<256x128xbf16>
    %c0_6 = arith.constant 0 : index
    %c0_7 = arith.constant 0 : index
    %10 = vector.load %arg4[%c0_6, %c0_7] : memref<128x128xbf16, #tpu.memory_space<vmem>>, vector<128x128xbf16>
    %cst_8 = arith.constant dense<0.000000e+00> : vector<256x128xf32>
    %11 = tpu.matmul %9, %10, %cst_8 {dimension_numbers = #tpu.dot_dimension_numbers<[1], [0], [0], [1], [0, 0, 1, 1], [], []>} : vector<256x128xbf16>, vector<128x128xbf16>, vector<256x128xf32> -> vector<256x128xf32>
    %c0_9 = arith.constant 0 : index
    %c0_10 = arith.constant 0 : index
    %12 = vector.load %arg5[%c0_9, %c0_10] : memref<1x128xf32, #tpu.memory_space<vmem>>, vector<1x128xf32>
    %13 = vector.broadcast %12 : vector<1x128xf32> to vector<256x128xf32>
    %14 = arith.addf %11, %13 : vector<256x128xf32>
    %cst_11 = arith.constant 0.000000e+00 : f32
    %15 = vector.broadcast %cst_11 : f32 to vector<256x128xf32>
    %16 = arith.maximumf %14, %15 : vector<256x128xf32>
    %c0_12 = arith.constant 0 : index
    %c0_13 = arith.constant 0 : index
    %17 = vector.load %arg10[%c0_12, %c0_13] : memref<256x128xf32, #tpu.memory_space<vmem>>, vector<256x128xf32>
    tpu.vector_store %arg10[%c0_12, %c0_13], %16 {strides = array<i32>} : memref<256x128xf32, #tpu.memory_space<vmem>>, vector<256x128xf32>,
    %18 = arith.truncf %16 : vector<256x128xf32> to vector<256x128xbf16>
    %c0_14 = arith.constant 0 : index
    %c0_15 = arith.constant 0 : index
    %19 = vector.load %arg6[%c0_14, %c0_15] : memref<128x32xbf16, #tpu.memory_space<vmem>>, vector<128x32xbf16>
    %cst_16 = arith.constant dense<0.000000e+00> : vector<256x32xf32>
    %20 = tpu.matmul %18, %19, %cst_16 {dimension_numbers = #tpu.dot_dimension_numbers<[1], [0], [0], [1], [0, 0, 1, 1], [], []>} : vector<256x128xbf16>, vector<128x32xbf16>, vector<256x32xf32> -> vector<256x32xf32>
    %c0_17 = arith.constant 0 : index
    %c0_18 = arith.constant 0 : index
    %21 = vector.load %arg7[%c0_17, %c0_18] : memref<1x32xf32, #tpu.memory_space<vmem>>, vector<1x32xf32>
    %22 = vector.broadcast %21 : vector<1x32xf32> to vector<256x32xf32>
    %23 = arith.addf %20, %22 : vector<256x32xf32>
    %c0_19 = arith.constant 0 : index
    %c0_20 = arith.constant 0 : index
    %24 = vector.load %arg11[%c0_19, %c0_20] : memref<256x32xf32, #tpu.memory_space<vmem>>, vector<256x32xf32>
    tpu.vector_store %arg11[%c0_19, %c0_20], %23 {strides = array<i32>} : memref<256x32xf32, #tpu.memory_space<vmem>>, vector<256x32xf32>,
    %c0_21 = arith.constant 0 : index
    %c0_22 = arith.constant 0 : index
    %25 = vector.load %arg8[%c0_21, %c0_22] : memref<128x16xbf16, #tpu.memory_space<vmem>>, vector<128x16xbf16>
    %cst_23 = arith.constant dense<0.000000e+00> : vector<256x16xf32>
    %26 = tpu.matmul %18, %25, %cst_23 {dimension_numbers = #tpu.dot_dimension_numbers<[1], [0], [0], [1], [0, 0, 1, 1], [], []>} : vector<256x128xbf16>, vector<128x16xbf16>, vector<256x16xf32> -> vector<256x16xf32>
    %c0_24 = arith.constant 0 : index
    %c0_25 = arith.constant 0 : index
    %27 = vector.load %arg9[%c0_24, %c0_25] : memref<1x16xf32, #tpu.memory_space<vmem>>, vector<1x16xf32>
    %28 = vector.broadcast %27 : vector<1x16xf32> to vector<256x16xf32>
    %29 = arith.addf %26, %28 : vector<256x16xf32>
    %c0_26 = arith.constant 0 : index
    %c0_27 = arith.constant 0 : index
    %30 = vector.load %arg12[%c0_26, %c0_27] : memref<256x16xf32, #tpu.memory_space<vmem>>, vector<256x16xf32>
    tpu.vector_store %arg12[%c0_26, %c0_27], %29 {strides = array<i32>} : memref<256x16xf32, #tpu.memory_space<vmem>>, vector<256x16xf32>,
    return
  }
  func.func @transform_0(%arg0: i32) -> (i32, i32) {
    %c0_i32 = arith.constant 0 : i32
    %c0_i32_0 = arith.constant 0 : i32
    return %arg0, %c0_i32 : i32, i32
  }
  func.func @transform_1(%arg0: i32) -> (i32, i32) {
    %c0_i32 = arith.constant 0 : i32
    %c0_i32_0 = arith.constant 0 : i32
    %c0_i32_1 = arith.constant 0 : i32
    return %c0_i32, %c0_i32_0 : i32, i32
  }
  func.func @transform_2(%arg0: i32) -> (i32, i32) {
    %c0_i32 = arith.constant 0 : i32
    %c0_i32_0 = arith.constant 0 : i32
    %c0_i32_1 = arith.constant 0 : i32
    return %c0_i32, %c0_i32_0 : i32, i32
  }
  func.func @transform_3(%arg0: i32) -> (i32, i32) {
    %c0_i32 = arith.constant 0 : i32
    %c0_i32_0 = arith.constant 0 : i32
    %c0_i32_1 = arith.constant 0 : i32
    return %c0_i32, %c0_i32_0 : i32, i32
  }
  func.func @transform_4(%arg0: i32) -> (i32, i32) {
    %c0_i32 = arith.constant 0 : i32
    %c0_i32_0 = arith.constant 0 : i32
    %c0_i32_1 = arith.constant 0 : i32
    return %c0_i32, %c0_i32_0 : i32, i32
  }
  func.func @transform_5(%arg0: i32) -> (i32, i32) {
    %c0_i32 = arith.constant 0 : i32
    %c0_i32_0 = arith.constant 0 : i32
    %c0_i32_1 = arith.constant 0 : i32
    return %c0_i32, %c0_i32_0 : i32, i32
  }
  func.func @transform_6(%arg0: i32) -> (i32, i32) {
    %c0_i32 = arith.constant 0 : i32
    %c0_i32_0 = arith.constant 0 : i32
    %c0_i32_1 = arith.constant 0 : i32
    return %c0_i32, %c0_i32_0 : i32, i32
  }
  func.func @transform_7(%arg0: i32) -> (i32, i32) {
    %c0_i32 = arith.constant 0 : i32
    %c0_i32_0 = arith.constant 0 : i32
    %c0_i32_1 = arith.constant 0 : i32
    return %c0_i32, %c0_i32_0 : i32, i32
  }
  func.func @transform_8(%arg0: i32) -> (i32, i32) {
    %c0_i32 = arith.constant 0 : i32
    %c0_i32_0 = arith.constant 0 : i32
    %c0_i32_1 = arith.constant 0 : i32
    return %c0_i32, %c0_i32_0 : i32, i32
  }
  func.func @transform_9(%arg0: i32) -> (i32, i32) {
    %c0_i32 = arith.constant 0 : i32
    %c0_i32_0 = arith.constant 0 : i32
    return %arg0, %c0_i32 : i32, i32
  }
  func.func @transform_10(%arg0: i32) -> (i32, i32) {
    %c0_i32 = arith.constant 0 : i32
    %c0_i32_0 = arith.constant 0 : i32
    return %arg0, %c0_i32 : i32, i32
  }
  func.func @transform_11(%arg0: i32) -> (i32, i32) {
    %c0_i32 = arith.constant 0 : i32
    %c0_i32_0 = arith.constant 0 : i32
    return %arg0, %c0_i32 : i32, i32
  }
}

</mosaic_0001>

<bundles_post_ra>
// kernel: tpu_custom_call.1
= control target key start
LH: loop header
LB: loop body
LE: loop exit
PB: predicated region body
PF: predicated region fallthrough
CT: control target
= control target key end

     0   :  { %s1772_s0 = inlined_call_operand.vmem [shape: f32[256,32], index: 0, kind: input, shape index: {}]   ;;  %s1773_s1 = inlined_call_operand.vmem [shape: bf16[32,128], index: 1, kind: input, shape index: {}]   ;;  %s1774_s2 = inlined_call_operand.vmem [shape: f32[1,128], index: 2, kind: input, shape index: {}]   ;;  %s1775_s3 = inlined_call_operand.vmem [shape: bf16[128,128], index: 3, kind: input, shape index: {}]   ;;  %s1776_s4 = inlined_call_operand.vmem [shape: f32[1,128], index: 4, kind: input, shape index: {}]   ;;  %s1777_s5 = inlined_call_operand.vmem [shape: bf16[128,32], index: 5, kind: input, shape index: {}]   ;;  %s1778_s6 = inlined_call_operand.vmem [shape: f32[1,32], index: 6, kind: input, shape index: {}]   ;;  %s1779_s7 = inlined_call_operand.vmem [shape: bf16[128,16], index: 7, kind: input, shape index: {}]   ;;  %s1780_s8 = inlined_call_operand.vmem [shape: f32[1,16], index: 8, kind: input, shape index: {}]   ;;  %s1781_s9 = inlined_call_operand.hbm [shape: f32[256,128], index: 9, kind: output, shape index: {0}]   ;;  %s1782_s10 = inlined_call_operand.vmem [shape: f32[256,32], index: 10, kind: output, shape index: {1}]   ;;  %s1783_s11 = inlined_call_operand.vmem [shape: f32[256,16], index: 11, kind: output, shape index: {2}]  }
   0x1   :  { %v1054_v0 = vld [vmem:[%s1773_s1 + $0x8] sm:$0xff]  ;;  %v1053_v1 = vld [vmem:[%s1773_s1] sm:$0xff] }
   0x2   :  { %160 = vmatpush.bf16.msra.mxu0 %v1054_v0  ;;  %v37_v2 = vld [vmem:[%s1772_s0] sm:$0xff]  ;;  %v38_v3 = vld [vmem:[%s1772_s0 + $0x8] sm:$0xff] }
   0x3   :  { %17 = vsyncpa [#allocation3], 0  ;;  %v69_v4 = vpack.c.bf16 %v38_v3, %v37_v2  ;;  %vm105_vm0 = vcmask 261120   ;;  %v39_v5 = vld [vmem:[%s1772_s0 + $0x10] sm:$0xff]  ;;  %v40_v6 = vld [vmem:[%s1772_s0 + $0x18] sm:$0xff]  ;;  %vm874_vm1 = vcmask 130048  }
   0x4   :  { %v70_v7 = vpack.c.bf16 %v40_v6, %v39_v5  ;;  %v41_v8 = vld [vmem:[%s1772_s0 + $0x20] sm:$0xff]  ;;  %v42_v9 = vld [vmem:[%s1772_s0 + $0x28] sm:$0xff]  ;;  %v43_v11 = vld [vmem:[%s1772_s0 + $0x30] sm:$0xff]  ;;  %s1112_s14 = smov [#allocation2]   ;;  %s1113_s20 = smov 128  }
   0x5   :  { %v71_v10 = vpack.c.bf16 %v42_v9, %v41_v8  ;;  %v44_v12 = vld [vmem:[%s1772_s0 + $0x38] sm:$0xff]  ;;  %v45_v14 = vld [vmem:[%s1772_s0 + $0x40] sm:$0xff]  ;;  %v46_v15 = vld [vmem:[%s1772_s0 + $0x48] sm:$0xff]  ;;  %s911_s15 = sshll.u32 %s1112_s14, 4  ;;  %s1114_s21 = smov 8   ;;  %s912_s15 = int_to_ptr.vmem [resolvable:$true] %s911_s15 }
   0x6   :  { %161 = vmatpush.bf16.msra.mxu0 %v1053_v1  ;;  %v72_v13 = vpack.c.bf16 %v44_v12, %v43_v11  ;;  %v73_v16 = vpack.c.bf16 %v46_v15, %v45_v14  ;;  %v1062_v17 = vld [vmem:[%s1775_s3 + $0x38] sm:$0xff]  ;;  %v47_v18 = vld [vmem:[%s1772_s0 + $0x50] sm:$0xff]  ;;  %v1060_v22 = vld [vmem:[%s1775_s3 + $0x28] sm:$0xff] }
   0x7   :  { %359 = vmatpush.bf16.msra.mxu1 %v1062_v17  ;;  %v48_v19 = vld [vmem:[%s1772_s0 + $0x58] sm:$0xff]  ;;  %v1061_v21 = vld [vmem:[%s1775_s3 + $0x30] sm:$0xff]  ;;  %v1059_v23 = vld [vmem:[%s1775_s3 + $0x20] sm:$0xff] }
   0x8   :  { %v74_v20 = vpack.c.bf16 %v48_v19, %v47_v18  ;;  %v49_v24 = vld [vmem:[%s1772_s0 + $0x60] sm:$0xff]  ;;  %v50_v25 = vld [vmem:[%s1772_s0 + $0x68] sm:$0xff]  ;;  %v1058_v26 = vld [vmem:[%s1775_s3 + $0x18] sm:$0xff] }
   0x9   :  { %941 = vmatmul.msk.bf16.vlgmr.msra.gmra.mxu0 %vm105_vm0, %v69_v4  ;;  %v75_v27 = vpack.c.bf16 %v50_v25, %v49_v24  ;;  %v1057_v28 = vld [vmem:[%s1775_s3 + $0x10] sm:$0xff]  ;;  %v1056_v29 = vld [vmem:[%s1775_s3 + $0x8] sm:$0xff]  ;;  %v1055_v30 = vld [vmem:[%s1775_s3] sm:$0xff] }
   0xa   :  { %v51_v31 = vld [vmem:[%s1772_s0 + $0x70] sm:$0xff]  ;;  %v52_v32 = vld [vmem:[%s1772_s0 + $0x78] sm:$0xff]  ;;  %v53_v34 = vld [vmem:[%s1772_s0 + $0x80] sm:$0xff] }
   0xb   :  { %360 = vmatpush.bf16.msra.mxu1 %v1061_v21  ;;  %v76_v33 = vpack.c.bf16 %v52_v32, %v51_v31  ;;  %v54_v35 = vld [vmem:[%s1772_s0 + $0x88] sm:$0xff]  ;;  %v1270_v38 = vld [vmem:[%s1774_s2] ss:$0 sm:$0xff]  ;;  %v55_v44 = vld [vmem:[%s1772_s0 + $0x90] sm:$0xff]  ;;  %s913_s2 = sshll.u32 %s1781_s9, 4  ;;  %s914_s2 = int_to_ptr.hbm [resolvable:$true] %s913_s2 }
   0xc   :  { %v77_v36 = vpack.c.bf16 %v54_v35, %v53_v34  ;;  %v56_v45 = vld [vmem:[%s1772_s0 + $0x98] sm:$0xff]  ;;  %v57_v54 = vld [vmem:[%s1772_s0 + $0xa0] sm:$0xff]  ;;  %v58_v55 = vld [vmem:[%s1772_s0 + $0xa8] sm:$0xff] }
   0xd   :  { %v78_v47 = vpack.c.bf16 %v56_v45, %v55_v44  ;;  %v79_v57 = vpack.c.bf16 %v58_v55, %v57_v54  ;;  %v59_v0 = vld [vmem:[%s1772_s0 + $0xb0] sm:$0xff]  ;;  %v60_v1 = vld [vmem:[%s1772_s0 + $0xb8] sm:$0xff]  ;;  %v62_v11 = vld [vmem:[%s1772_s0 + $0xc8] sm:$0xff] }
   0xe   :  { %v80_v3 = vpack.c.bf16 %v60_v1, %v59_v0  ;;  %v64_v21 = vld [vmem:[%s1772_s0 + $0xd8] sm:$0xff]  ;;  %v65_v32 = vld [vmem:[%s1772_s0 + $0xe0] sm:$0xff]  ;;  %v1069_v35 = vld [vmem:[%s1777_s5 + $0x30] sm:$0xff] }
   0xf   :  { %361 = vmatpush.bf16.msra.mxu1 %v1060_v22  ;;  %v1065_v54 = vld [vmem:[%s1777_s5 + $0x10] sm:$0xff] }
  0x10   :  { %v1073_v55 = vld [vmem:[%s1779_s7 + $0x10] sm:$0xff] }
  0x13   :  { %362 = vmatpush.bf16.msra.mxu1 %v1059_v23 }
  0x17   :  { %363 = vmatpush.bf16.msra.mxu1 %v1058_v26 }
  0x19   :  { %942 = vmatmul.msk.bf16.gmra.mxu0 %vm105_vm0, %v70_v7 }
  0x1b   :  { %364 = vmatpush.bf16.msra.mxu1 %v1057_v28  ;;  %v1070_v28 = vld [vmem:[%s1777_s5 + $0x38] sm:$0xff] }
  0x1c   :  { %596 = vmatpush.bf16.msra.mxu2 %v1070_v28 }
  0x1f   :  { %365 = vmatpush.bf16.msra.mxu1 %v1056_v29  ;;  %v1078_v29 = vld [vmem:[%s1779_s7 + $0x38] sm:$0xff] }
  0x20   :  { %785 = vmatpush.bf16.msra.mxu3 %v1078_v29  ;;  %597 = vmatpush.bf16.msra.mxu2 %v1069_v35 }
  0x23   :  { %366 = vmatpush.bf16.msra.mxu1 %v1055_v30 }
  0x29   :  { %943 = vmatmul.msk.bf16.gmra.mxu0 %vm105_vm0, %v71_v10  ;;  %v61_v10 = vld [vmem:[%s1772_s0 + $0xc0] sm:$0xff] }
  0x39   :  { %944 = vmatmul.msk.bf16.gmra.mxu0 %vm105_vm0, %v72_v13  ;;  %v81_v13 = vpack.c.bf16 %v62_v11, %v61_v10 }
  0x49   :  { %945 = vmatmul.msk.bf16.gmra.mxu0 %vm105_vm0, %v73_v16 }
  0x59   :  { %946 = vmatmul.msk.bf16.gmra.mxu0 %vm105_vm0, %v74_v20  ;;  %v63_v20 = vld [vmem:[%s1772_s0 + $0xd0] sm:$0xff] }
  0x5a   :  { %v82_v23 = vpack.c.bf16 %v64_v21, %v63_v20 }
  0x69   :  { %947 = vmatmul.msk.bf16.gmra.mxu0 %vm105_vm0, %v75_v27 }
  0x79   :  { %948 = vmatmul.msk.bf16.gmra.mxu0 %vm105_vm0, %v76_v33  ;;  %v66_v33 = vld [vmem:[%s1772_s0 + $0xe8] sm:$0xff] }
  0x86   :  { %v163_v37 = vpop.f32.mrf.mxu0 }
  0x87   :  { %v164_v39 = vadd.f32 %v1270_v38, %v163_v37  ;;  %v83_v37 = vpack.c.bf16 %v66_v33, %v65_v32 }
  0x89   :  { %949 = vmatmul.msk.bf16.gmra.mxu0 %vm105_vm0, %v77_v36  ;;  %v243_v42 = vmax.f32 %v164_v39, 0.0  ;;  %v1077_v36 = vld [vmem:[%s1779_s7 + $0x30] sm:$0xff] }
  0x8a   :  { %786 = vmatpush.bf16.msra.mxu3 %v1077_v36 }
  0x8e   :  { %v165_v40 = vpop.f32.mrf.mxu0 }
  0x8f   :  { %v166_v41 = vadd.f32 %v1270_v38, %v165_v40  ;;  %v1068_v40 = vld [vmem:[%s1777_s5 + $0x28] sm:$0xff] }
  0x90   :  { %598 = vmatpush.bf16.msra.mxu2 %v1068_v40 }
  0x91   :  { %v244_v43 = vmax.f32 %v166_v41, 0.0  ;;  %v1076_v41 = vld [vmem:[%s1779_s7 + $0x28] sm:$0xff] }
  0x92   :  { %787 = vmatpush.bf16.msra.mxu3 %v1076_v41 }
  0x93   :  { %v275_v46 = vpack.c.bf16 %v244_v43, %v243_v42  ;;  %v1067_v42 = vld [vmem:[%s1777_s5 + $0x20] sm:$0xff] }
  0x94   :  { %v1075_v43 = vld [vmem:[%s1779_s7 + $0x20] sm:$0xff]  ;;  %599 = vmatpush.bf16.msra.mxu2 %v1067_v42 }
  0x95   :  { %367 = vmatmul.bf16.vlgmr.msra.gmra.mxu1 %v275_v46 }
  0x96   :  { %v168_v48 = vpop.f32.mrf.mxu0  ;;  %788 = vmatpush.bf16.msra.mxu3 %v1075_v43 }
  0x97   :  { %v169_v49 = vadd.f32 %v1270_v38, %v168_v48  ;;  %v1074_v48 = vld [vmem:[%s1779_s7 + $0x18] sm:$0xff] }
  0x99   :  { %950 = vmatmul.msk.bf16.gmra.mxu0 %vm105_vm0, %v78_v47  ;;  %v245_v52 = vmax.f32 %v169_v49, 0.0  ;;  %v1066_v47 = vld [vmem:[%s1777_s5 + $0x18] sm:$0xff] }
  0x9a   :  { %600 = vmatpush.bf16.msra.mxu2 %v1066_v47  ;;  %789 = vmatpush.bf16.msra.mxu3 %v1074_v48 }
  0x9e   :  { %v170_v50 = vpop.f32.mrf.mxu0  ;;  %601 = vmatpush.bf16.msra.mxu2 %v1065_v54  ;;  %790 = vmatpush.bf16.msra.mxu3 %v1073_v55 }
  0x9f   :  { %v171_v51 = vadd.f32 %v1270_v38, %v170_v50 }
  0xa1   :  { %v246_v53 = vmax.f32 %v171_v51, 0.0  ;;  %v67_v51 = vld [vmem:[%s1772_s0 + $0xf0] sm:$0xff] }
  0xa3   :  { %v276_v56 = vpack.c.bf16 %v246_v53, %v245_v52  ;;  %v68_v52 = vld [vmem:[%s1772_s0 + $0xf8] sm:$0xff] }
  0xa5   :  { %372 = vmatmul.bf16.gmra.mxu1 %v276_v56  ;;  %v84_v56 = vpack.c.bf16 %v68_v52, %v67_v51 }
  0xa6   :  { %v173_v58 = vpop.f32.mrf.mxu0 }
  0xa7   :  { %v174_v59 = vadd.f32 %v1270_v38, %v173_v58  ;;  %v1064_v58 = vld [vmem:[%s1777_s5 + $0x8] sm:$0xff] }
  0xa8   :  { %602 = vmatpush.bf16.msra.mxu2 %v1064_v58 }
  0xa9   :  { %951 = vmatmul.msk.bf16.gmra.mxu0 %vm105_vm0, %v79_v57  ;;  %v247_v62 = vmax.f32 %v174_v59, 0.0  ;;  %v1072_v59 = vld [vmem:[%s1779_s7 + $0x8] sm:$0xff] }
  0xaa   :  { %791 = vmatpush.bf16.msra.mxu3 %v1072_v59 }
  0xae   :  { %v175_v60 = vpop.f32.mrf.mxu0 }
  0xaf   :  { %v176_v61 = vadd.f32 %v1270_v38, %v175_v60  ;;  %v1063_v60 = vld [vmem:[%s1777_s5] sm:$0xff] }
  0xb0   :  { %603 = vmatpush.bf16.msra.mxu2 %v1063_v60 }
  0xb1   :  { %v248_v63 = vmax.f32 %v176_v61, 0.0  ;;  %v1071_v61 = vld [vmem:[%s1779_s7] sm:$0xff] }
  0xb2   :  { %792 = vmatpush.bf16.msra.mxu3 %v1071_v61 }
  0xb3   :  { %v277_v2 = vpack.c.bf16 %v248_v63, %v247_v62 }
  0xb5   :  { %377 = vmatmul.bf16.gmra.mxu1 %v277_v2 }
  0xb6   :  { %v178_v4 = vpop.f32.mrf.mxu0 }
  0xb7   :  { %v179_v5 = vadd.f32 %v1270_v38, %v178_v4 }
  0xb9   :  { %952 = vmatmul.msk.bf16.gmra.mxu0 %vm105_vm0, %v80_v3  ;;  %v249_v8 = vmax.f32 %v179_v5, 0.0 }
  0xbe   :  { %v180_v6 = vpop.f32.mrf.mxu0 }
  0xbf   :  { %v181_v7 = vadd.f32 %v1270_v38, %v180_v6 }
  0xc1   :  { %v250_v9 = vmax.f32 %v181_v7, 0.0 }
  0xc3   :  { %v278_v12 = vpack.c.bf16 %v250_v9, %v249_v8  ;;  %v1391_v8 = vld [vmem:[%s1776_s4] ss:$0 sm:$0xff] }
  0xc5   :  { %382 = vmatmul.bf16.gmra.mxu1 %v278_v12 }
  0xc6   :  { %v183_v14 = vpop.f32.mrf.mxu0 }
  0xc7   :  { %v184_v15 = vadd.f32 %v1270_v38, %v183_v14 }
  0xc9   :  { %953 = vmatmul.msk.bf16.gmra.mxu0 %vm105_vm0, %v81_v13  ;;  %v251_v18 = vmax.f32 %v184_v15, 0.0 }
  0xce   :  { %v185_v16 = vpop.f32.mrf.mxu0 }
  0xcf   :  { %v186_v17 = vadd.f32 %v1270_v38, %v185_v16 }
  0xd1   :  { %v252_v19 = vmax.f32 %v186_v17, 0.0 }
  0xd3   :  { %v279_v22 = vpack.c.bf16 %v252_v19, %v251_v18 }
  0xd5   :  { %387 = vmatmul.bf16.gmra.mxu1 %v279_v22 }
  0xd6   :  { %v188_v24 = vpop.f32.mrf.mxu0 }
  0xd7   :  { %v189_v25 = vadd.f32 %v1270_v38, %v188_v24 }
  0xd9   :  { %954 = vmatmul.msk.bf16.gmra.mxu0 %vm105_vm0, %v82_v23  ;;  %v253_v30 = vmax.f32 %v189_v25, 0.0 }
  0xde   :  { %v190_v26 = vpop.f32.mrf.mxu0 }
  0xdf   :  { %v191_v27 = vadd.f32 %v1270_v38, %v190_v26 }
  0xe1   :  { %v254_v31 = vmax.f32 %v191_v27, 0.0 }
  0xe3   :  { %v280_v34 = vpack.c.bf16 %v254_v31, %v253_v30 }
  0xe5   :  { %392 = vmatmul.bf16.gmra.mxu1 %v280_v34 }
  0xe6   :  { %v193_v39 = vpop.f32.mrf.mxu0 }
  0xe7   :  { %v194_v44 = vadd.f32 %v1270_v38, %v193_v39 }
  0xe9   :  { %955 = vmatmul.msk.bf16.gmra.mxu0 %vm105_vm0, %v83_v37  ;;  %v255_v49 = vmax.f32 %v194_v44, 0.0 }
  0xee   :  { %v195_v45 = vpop.f32.mrf.mxu0 }
  0xef   :  { %v196_v46 = vadd.f32 %v1270_v38, %v195_v45 }
  0xf1   :  { %v256_v50 = vmax.f32 %v196_v46, 0.0 }
  0xf3   :  { %v281_v53 = vpack.c.bf16 %v256_v50, %v255_v49 }
  0xf5   :  { %397 = vmatmul.bf16.gmra.mxu1 %v281_v53 }
  0xf6   :  { %v198_v57 = vpop.f32.mrf.mxu0 }
  0xf7   :  { %v199_v62 = vadd.f32 %v1270_v38, %v198_v57 }
  0xf9   :  { %956 = vmatmul.msk.bf16.gmra.mxu0 %vm105_vm0, %v84_v56  ;;  %v257_v1 = vmax.f32 %v199_v62, 0.0 }
  0xfe   :  { %v200_v63 = vpop.f32.mrf.mxu0 }
  0xff   :  { %v201_v0 = vadd.f32 %v1270_v38, %v200_v63 }
 0x101   :  { %v258_v2 = vmax.f32 %v201_v0, 0.0 }
 0x103   :  { %v282_v3 = vpack.c.bf16 %v258_v2, %v257_v1 }
 0x105   :  { %402 = vmatmul.bf16.gmra.mxu1 %v282_v3 }
 0x106   :  { %v203_v4 = vpop.f32.mrf.mxu0 }
 0x107   :  { %v204_v5 = vadd.f32 %v1270_v38, %v203_v4 }
 0x109   :  { %v259_v9 = vmax.f32 %v204_v5, 0.0 }
 0x10e   :  { %v205_v6 = vpop.f32.mrf.mxu0 }
 0x10f   :  { %v206_v7 = vadd.f32 %v1270_v38, %v205_v6 }
 0x111   :  { %v260_v10 = vmax.f32 %v206_v7, 0.0 }
 0x112   :  { %v368_v11 = vpop.f32.mrf.mxu1 }
 0x113   :  { %v369_v12 = vadd.f32 %v1391_v8, %v368_v11  ;;  %v283_v13 = vpack.c.bf16 %v260_v10, %v259_v9 }
 0x115   :  { %v448_v14 = vmax.f32 %v369_v12, 0.0  ;;  %407 = vmatmul.bf16.gmra.mxu1 %v283_v13 }
 0x116   :  { %v208_v15 = vpop.f32.mrf.mxu0 }
 0x117   :  { %480 = vst [vmem:[#allocation2] sm:$0xff] %v448_v14  ;;  %v209_v18 = vadd.f32 %v1270_v38, %v208_v15 }
 0x119   :  { %v261_v23 = vmax.f32 %v209_v18, 0.0 }
 0x11a   :  { %v370_v16 = vpop.f32.mrf.mxu1 }
 0x11b   :  { %v371_v17 = vadd.f32 %v1391_v8, %v370_v16 }
 0x11d   :  { %v449_v19 = vmax.f32 %v371_v17, 0.0 }
 0x11e   :  { %v210_v20 = vpop.f32.mrf.mxu0 }
 0x11f   :  { %481 = vst [vmem:[#allocation2 + $0x8] sm:$0xff] %v449_v19  ;;  %v211_v21 = vadd.f32 %v1270_v38, %v210_v20  ;;  %v512_v22 = vpack.c.bf16 %v449_v19, %v448_v14 }
 0x121   :  { %v262_v24 = vmax.f32 %v211_v21, 0.0  ;;  %604 = vmatmul.bf16.vlgmr.msra.gmra.mxu2 %v512_v22  ;;  %793 = vmatmul.bf16.vlgmr.msra.gmra.mxu3 %v512_v22 }
 0x122   :  { %v373_v25 = vpop.f32.mrf.mxu1 }
 0x123   :  { %v374_v26 = vadd.f32 %v1391_v8, %v373_v25  ;;  %v284_v27 = vpack.c.bf16 %v262_v24, %v261_v23 }
 0x125   :  { %v450_v28 = vmax.f32 %v374_v26, 0.0  ;;  %412 = vmatmul.bf16.gmra.mxu1 %v284_v27 }
 0x126   :  { %v213_v29 = vpop.f32.mrf.mxu0 }
 0x127   :  { %482 = vst [vmem:[#allocation2 + $0x10] sm:$0xff] %v450_v28  ;;  %v214_v32 = vadd.f32 %v1270_v38, %v213_v29 }
 0x129   :  { %v263_v37 = vmax.f32 %v214_v32, 0.0 }
 0x12a   :  { %v375_v30 = vpop.f32.mrf.mxu1 }
 0x12b   :  { %v376_v31 = vadd.f32 %v1391_v8, %v375_v30 }
 0x12d   :  { %v451_v33 = vmax.f32 %v376_v31, 0.0 }
 0x12e   :  { %v215_v34 = vpop.f32.mrf.mxu0 }
 0x12f   :  { %483 = vst [vmem:[#allocation2 + $0x18] sm:$0xff] %v451_v33  ;;  %v216_v35 = vadd.f32 %v1270_v38, %v215_v34  ;;  %v513_v36 = vpack.c.bf16 %v451_v33, %v450_v28 }
 0x131   :  { %v264_v39 = vmax.f32 %v216_v35, 0.0  ;;  %609 = vmatmul.bf16.gmra.mxu2 %v513_v36  ;;  %798 = vmatmul.bf16.gmra.mxu3 %v513_v36 }
 0x132   :  { %v378_v40 = vpop.f32.mrf.mxu1 }
 0x133   :  { %v379_v41 = vadd.f32 %v1391_v8, %v378_v40  ;;  %v285_v42 = vpack.c.bf16 %v264_v39, %v263_v37 }
 0x135   :  { %v452_v43 = vmax.f32 %v379_v41, 0.0  ;;  %417 = vmatmul.bf16.gmra.mxu1 %v285_v42 }
 0x136   :  { %v218_v44 = vpop.f32.mrf.mxu0 }
 0x137   :  { %484 = vst [vmem:[#allocation2 + $0x20] sm:$0xff] %v452_v43  ;;  %v219_v47 = vadd.f32 %v1270_v38, %v218_v44 }
 0x139   :  { %v265_v52 = vmax.f32 %v219_v47, 0.0 }
 0x13a   :  { %v380_v45 = vpop.f32.mrf.mxu1 }
 0x13b   :  { %v381_v46 = vadd.f32 %v1391_v8, %v380_v45 }
 0x13d   :  { %v453_v48 = vmax.f32 %v381_v46, 0.0 }
 0x13e   :  { %v220_v49 = vpop.f32.mrf.mxu0 }
 0x13f   :  { %485 = vst [vmem:[#allocation2 + $0x28] sm:$0xff] %v453_v48  ;;  %v221_v50 = vadd.f32 %v1270_v38, %v220_v49  ;;  %v514_v51 = vpack.c.bf16 %v453_v48, %v452_v43 }
 0x141   :  { %v266_v53 = vmax.f32 %v221_v50, 0.0  ;;  %614 = vmatmul.bf16.gmra.mxu2 %v514_v51  ;;  %803 = vmatmul.bf16.gmra.mxu3 %v514_v51 }
 0x142   :  { %v383_v54 = vpop.f32.mrf.mxu1 }
 0x143   :  { %v384_v55 = vadd.f32 %v1391_v8, %v383_v54  ;;  %v286_v56 = vpack.c.bf16 %v266_v53, %v265_v52 }
 0x145   :  { %v454_v57 = vmax.f32 %v384_v55, 0.0  ;;  %422 = vmatmul.bf16.gmra.mxu1 %v286_v56 }
 0x146   :  { %v223_v58 = vpop.f32.mrf.mxu0 }
 0x147   :  { %486 = vst [vmem:[#allocation2 + $0x30] sm:$0xff] %v454_v57  ;;  %v224_v61 = vadd.f32 %v1270_v38, %v223_v58 }
 0x149   :  { %v267_v2 = vmax.f32 %v224_v61, 0.0 }
 0x14a   :  { %v385_v59 = vpop.f32.mrf.mxu1 }
 0x14b   :  { %v386_v60 = vadd.f32 %v1391_v8, %v385_v59 }
 0x14d   :  { %v455_v62 = vmax.f32 %v386_v60, 0.0 }
 0x14e   :  { %v225_v63 = vpop.f32.mrf.mxu0 }
 0x14f   :  { %487 = vst [vmem:[#allocation2 + $0x38] sm:$0xff] %v455_v62  ;;  %v226_v0 = vadd.f32 %v1270_v38, %v225_v63  ;;  %v515_v1 = vpack.c.bf16 %v455_v62, %v454_v57  ;;  %v1428_v62 = vld [vmem:[%s1778_s6] ss:$0 sm:$0xff] }
 0x150   :  { %v1433_v63 = vld [vmem:[%s1780_s8] ss:$0 sm:$0xff] }
 0x151   :  { %v268_v3 = vmax.f32 %v226_v0, 0.0  ;;  %619 = vmatmul.bf16.gmra.mxu2 %v515_v1  ;;  %808 = vmatmul.bf16.gmra.mxu3 %v515_v1 }
 0x152   :  { %v388_v4 = vpop.f32.mrf.mxu1 }
 0x153   :  { %v287_v5 = vpack.c.bf16 %v268_v3, %v267_v2  ;;  %v389_v6 = vadd.f32 %v1391_v8, %v388_v4 }
 0x155   :  { %v456_v7 = vmax.f32 %v389_v6, 0.0  ;;  %427 = vmatmul.bf16.gmra.mxu1 %v287_v5 }
 0x156   :  { %v228_v9 = vpop.f32.mrf.mxu0 }
 0x157   :  { %488 = vst [vmem:[#allocation2 + $0x40] sm:$0xff] %v456_v7  ;;  %v229_v12 = vadd.f32 %v1270_v38, %v228_v9 }
 0x159   :  { %v269_v17 = vmax.f32 %v229_v12, 0.0 }
 0x15a   :  { %v390_v10 = vpop.f32.mrf.mxu1 }
 0x15b   :  { %v391_v11 = vadd.f32 %v1391_v8, %v390_v10 }
 0x15d   :  { %v457_v13 = vmax.f32 %v391_v11, 0.0 }
 0x15e   :  { %v230_v14 = vpop.f32.mrf.mxu0 }
 0x15f   :  { %489 = vst [vmem:[#allocation2 + $0x48] sm:$0xff] %v457_v13  ;;  %v231_v15 = vadd.f32 %v1270_v38, %v230_v14  ;;  %v516_v16 = vpack.c.bf16 %v457_v13, %v456_v7 }
 0x161   :  { %v270_v18 = vmax.f32 %v231_v15, 0.0  ;;  %624 = vmatmul.bf16.gmra.mxu2 %v516_v16  ;;  %813 = vmatmul.bf16.gmra.mxu3 %v516_v16 }
 0x162   :  { %v393_v19 = vpop.f32.mrf.mxu1 }
 0x163   :  { %v288_v20 = vpack.c.bf16 %v270_v18, %v269_v17  ;;  %v394_v21 = vadd.f32 %v1391_v8, %v393_v19 }
 0x165   :  { %v458_v22 = vmax.f32 %v394_v21, 0.0  ;;  %432 = vmatmul.bf16.gmra.mxu1 %v288_v20 }
 0x166   :  { %v233_v23 = vpop.f32.mrf.mxu0 }
 0x167   :  { %490 = vst [vmem:[#allocation2 + $0x50] sm:$0xff] %v458_v22  ;;  %v234_v26 = vadd.f32 %v1270_v38, %v233_v23 }
 0x169   :  { %v271_v31 = vmax.f32 %v234_v26, 0.0 }
 0x16a   :  { %v395_v24 = vpop.f32.mrf.mxu1 }
 0x16b   :  { %v396_v25 = vadd.f32 %v1391_v8, %v395_v24 }
 0x16d   :  { %v459_v27 = vmax.f32 %v396_v25, 0.0 }
 0x16e   :  { %v235_v28 = vpop.f32.mrf.mxu0 }
 0x16f   :  { %491 = vst [vmem:[#allocation2 + $0x58] sm:$0xff] %v459_v27  ;;  %v236_v29 = vadd.f32 %v1270_v38, %v235_v28  ;;  %v517_v30 = vpack.c.bf16 %v459_v27, %v458_v22 }
 0x171   :  { %v272_v32 = vmax.f32 %v236_v29, 0.0  ;;  %629 = vmatmul.bf16.gmra.mxu2 %v517_v30  ;;  %818 = vmatmul.bf16.gmra.mxu3 %v517_v30 }
 0x172   :  { %v398_v33 = vpop.f32.mrf.mxu1 }
 0x173   :  { %v289_v34 = vpack.c.bf16 %v272_v32, %v271_v31  ;;  %v399_v35 = vadd.f32 %v1391_v8, %v398_v33 }
 0x175   :  { %v460_v36 = vmax.f32 %v399_v35, 0.0  ;;  %437 = vmatmul.bf16.gmra.mxu1 %v289_v34 }
 0x176   :  { %v238_v37 = vpop.f32.mrf.mxu0 }
 0x177   :  { %492 = vst [vmem:[#allocation2 + $0x60] sm:$0xff] %v460_v36  ;;  %v239_v41 = vadd.f32 %v1270_v38, %v238_v37 }
 0x179   :  { %v273_v46 = vmax.f32 %v239_v41, 0.0 }
 0x17a   :  { %v400_v39 = vpop.f32.mrf.mxu1 }
 0x17b   :  { %v401_v40 = vadd.f32 %v1391_v8, %v400_v39 }
 0x17d   :  { %v461_v42 = vmax.f32 %v401_v40, 0.0 }
 0x17e   :  { %v240_v43 = vpop.f32.mrf.mxu0 }
 0x17f   :  { %493 = vst [vmem:[#allocation2 + $0x68] sm:$0xff] %v461_v42  ;;  %v241_v44 = vadd.f32 %v1270_v38, %v240_v43  ;;  %v518_v45 = vpack.c.bf16 %v461_v42, %v460_v36 }
 0x181   :  { %v274_v47 = vmax.f32 %v241_v44, 0.0  ;;  %634 = vmatmul.bf16.gmra.mxu2 %v518_v45  ;;  %823 = vmatmul.bf16.gmra.mxu3 %v518_v45 }
 0x182   :  { %v403_v48 = vpop.f32.mrf.mxu1 }
 0x183   :  { %v290_v49 = vpack.c.bf16 %v274_v47, %v273_v46  ;;  %v404_v50 = vadd.f32 %v1391_v8, %v403_v48 }
 0x185   :  { %v462_v51 = vmax.f32 %v404_v50, 0.0  ;;  %442 = vmatmul.bf16.gmra.mxu1 %v290_v49 }
 0x187   :  { %494 = vst [vmem:[#allocation2 + $0x70] sm:$0xff] %v462_v51 }
 0x18a   :  { %v405_v52 = vpop.f32.mrf.mxu1 }
 0x18b   :  { %v406_v53 = vadd.f32 %v1391_v8, %v405_v52 }
 0x18d   :  { %v463_v54 = vmax.f32 %v406_v53, 0.0 }
 0x18f   :  { %495 = vst [vmem:[#allocation2 + $0x78] sm:$0xff] %v463_v54  ;;  %v519_v55 = vpack.c.bf16 %v463_v54, %v462_v51 }
 0x191   :  { %639 = vmatmul.bf16.gmra.mxu2 %v519_v55  ;;  %828 = vmatmul.bf16.gmra.mxu3 %v519_v55 }
 0x192   :  { %v408_v38 = vpop.f32.mrf.mxu1 }
 0x193   :  { %v409_v56 = vadd.f32 %v1391_v8, %v408_v38 }
 0x195   :  { %v464_v57 = vmax.f32 %v409_v56, 0.0 }
 0x197   :  { %496 = vst [vmem:[#allocation2 + $0x80] sm:$0xff] %v464_v57 }
 0x19a   :  { %v410_v58 = vpop.f32.mrf.mxu1 }
 0x19b   :  { %v411_v59 = vadd.f32 %v1391_v8, %v410_v58 }
 0x19d   :  { %v465_v60 = vmax.f32 %v411_v59, 0.0 }
 0x19f   :  { %497 = vst [vmem:[#allocation2 + $0x88] sm:$0xff] %v465_v60  ;;  %v520_v61 = vpack.c.bf16 %v465_v60, %v464_v57 }
 0x1a1   :  { %644 = vmatmul.bf16.gmra.mxu2 %v520_v61  ;;  %833 = vmatmul.bf16.gmra.mxu3 %v520_v61 }
 0x1a2   :  { %v413_v0 = vpop.f32.mrf.mxu1 }
 0x1a3   :  { %v414_v1 = vadd.f32 %v1391_v8, %v413_v0 }
 0x1a4   :  { %v605_v2 = vpop.f32.mrf.mxu2  ;;  %v794_v3 = vpop.f32.mrf.mxu3 }
 0x1a5   :  { %v466_v4 = vmax.f32 %v414_v1, 0.0  ;;  %v606_v5 = vadd.f32 %v1428_v62, %v605_v2  ;;  %v795_v6 = vadd.f32 %v1433_v63, %v794_v3 }
 0x1a7   :  { %498 = vst [vmem:[#allocation2 + $0x90] sm:$0xff] %v466_v4 }
 0x1a8   :  { %685 = vst.msk [vmem:[%s1782_s10] sm:$0xff] %vm105_vm0, %v606_v5 }
 0x1a9   :  { %875 = vst.msk [vmem:[%s1783_s11] sm:$0xff] %vm874_vm1, %v795_v6 }
 0x1aa   :  { %v415_v7 = vpop.f32.mrf.mxu1 }
 0x1ab   :  { %v416_v9 = vadd.f32 %v1391_v8, %v415_v7 }
 0x1ac   :  { %v607_v10 = vpop.f32.mrf.mxu2  ;;  %v796_v11 = vpop.f32.mrf.mxu3 }
 0x1ad   :  { %v467_v12 = vmax.f32 %v416_v9, 0.0  ;;  %v608_v13 = vadd.f32 %v1428_v62, %v607_v10  ;;  %v797_v14 = vadd.f32 %v1433_v63, %v796_v11 }
 0x1af   :  { %499 = vst [vmem:[#allocation2 + $0x98] sm:$0xff] %v467_v12  ;;  %v521_v15 = vpack.c.bf16 %v467_v12, %v466_v4 }
 0x1b0   :  { %686 = vst.msk [vmem:[%s1782_s10 + $0x8] sm:$0xff] %vm105_vm0, %v608_v13 }
 0x1b1   :  { %876 = vst.msk [vmem:[%s1783_s11 + $0x8] sm:$0xff] %vm874_vm1, %v797_v14  ;;  %649 = vmatmul.bf16.gmra.mxu2 %v521_v15  ;;  %838 = vmatmul.bf16.gmra.mxu3 %v521_v15 }
 0x1b2   :  { %v418_v16 = vpop.f32.mrf.mxu1 }
 0x1b3   :  { %v419_v17 = vadd.f32 %v1391_v8, %v418_v16 }
 0x1b4   :  { %v610_v18 = vpop.f32.mrf.mxu2  ;;  %v799_v19 = vpop.f32.mrf.mxu3 }
 0x1b5   :  { %v468_v20 = vmax.f32 %v419_v17, 0.0  ;;  %v611_v21 = vadd.f32 %v1428_v62, %v610_v18  ;;  %v800_v22 = vadd.f32 %v1433_v63, %v799_v19 }
 0x1b7   :  { %500 = vst [vmem:[#allocation2 + $0xa0] sm:$0xff] %v468_v20 }
 0x1b8   :  { %687 = vst.msk [vmem:[%s1782_s10 + $0x10] sm:$0xff] %vm105_vm0, %v611_v21 }
 0x1b9   :  { %877 = vst.msk [vmem:[%s1783_s11 + $0x10] sm:$0xff] %vm874_vm1, %v800_v22 }
 0x1ba   :  { %v420_v23 = vpop.f32.mrf.mxu1 }
 0x1bb   :  { %v421_v24 = vadd.f32 %v1391_v8, %v420_v23 }
 0x1bc   :  { %v612_v25 = vpop.f32.mrf.mxu2  ;;  %v801_v26 = vpop.f32.mrf.mxu3 }
 0x1bd   :  { %v469_v27 = vmax.f32 %v421_v24, 0.0  ;;  %v613_v28 = vadd.f32 %v1428_v62, %v612_v25  ;;  %v802_v29 = vadd.f32 %v1433_v63, %v801_v26 }
 0x1bf   :  { %501 = vst [vmem:[#allocation2 + $0xa8] sm:$0xff] %v469_v27  ;;  %v522_v30 = vpack.c.bf16 %v469_v27, %v468_v20 }
 0x1c0   :  { %688 = vst.msk [vmem:[%s1782_s10 + $0x18] sm:$0xff] %vm105_vm0, %v613_v28 }
 0x1c1   :  { %878 = vst.msk [vmem:[%s1783_s11 + $0x18] sm:$0xff] %vm874_vm1, %v802_v29  ;;  %654 = vmatmul.bf16.gmra.mxu2 %v522_v30  ;;  %843 = vmatmul.bf16.gmra.mxu3 %v522_v30 }
 0x1c2   :  { %v423_v31 = vpop.f32.mrf.mxu1 }
 0x1c3   :  { %v424_v32 = vadd.f32 %v1391_v8, %v423_v31 }
 0x1c4   :  { %v615_v33 = vpop.f32.mrf.mxu2  ;;  %v804_v34 = vpop.f32.mrf.mxu3 }
 0x1c5   :  { %v470_v35 = vmax.f32 %v424_v32, 0.0  ;;  %v616_v36 = vadd.f32 %v1428_v62, %v615_v33  ;;  %v805_v37 = vadd.f32 %v1433_v63, %v804_v34 }
 0x1c7   :  { %502 = vst [vmem:[#allocation2 + $0xb0] sm:$0xff] %v470_v35 }
 0x1c8   :  { %689 = vst.msk [vmem:[%s1782_s10 + $0x20] sm:$0xff] %vm105_vm0, %v616_v36 }
 0x1c9   :  { %879 = vst.msk [vmem:[%s1783_s11 + $0x20] sm:$0xff] %vm874_vm1, %v805_v37 }
 0x1ca   :  { %v425_v39 = vpop.f32.mrf.mxu1 }
 0x1cb   :  { %v426_v40 = vadd.f32 %v1391_v8, %v425_v39 }
 0x1cc   :  { %v617_v41 = vpop.f32.mrf.mxu2  ;;  %v806_v42 = vpop.f32.mrf.mxu3 }
 0x1cd   :  { %v471_v43 = vmax.f32 %v426_v40, 0.0  ;;  %v618_v44 = vadd.f32 %v1428_v62, %v617_v41  ;;  %v807_v45 = vadd.f32 %v1433_v63, %v806_v42 }
 0x1cf   :  { %503 = vst [vmem:[#allocation2 + $0xb8] sm:$0xff] %v471_v43  ;;  %v523_v46 = vpack.c.bf16 %v471_v43, %v470_v35 }
 0x1d0   :  { %690 = vst.msk [vmem:[%s1782_s10 + $0x28] sm:$0xff] %vm105_vm0, %v618_v44 }
 0x1d1   :  { %880 = vst.msk [vmem:[%s1783_s11 + $0x28] sm:$0xff] %vm874_vm1, %v807_v45  ;;  %659 = vmatmul.bf16.gmra.mxu2 %v523_v46  ;;  %848 = vmatmul.bf16.gmra.mxu3 %v523_v46 }
 0x1d2   :  { %v428_v47 = vpop.f32.mrf.mxu1 }
 0x1d3   :  { %v429_v48 = vadd.f32 %v1391_v8, %v428_v47 }
 0x1d4   :  { %v620_v49 = vpop.f32.mrf.mxu2  ;;  %v809_v50 = vpop.f32.mrf.mxu3 }
 0x1d5   :  { %v472_v51 = vmax.f32 %v429_v48, 0.0  ;;  %v621_v52 = vadd.f32 %v1428_v62, %v620_v49  ;;  %v810_v53 = vadd.f32 %v1433_v63, %v809_v50 }
 0x1d7   :  { %504 = vst [vmem:[#allocation2 + $0xc0] sm:$0xff] %v472_v51 }
 0x1d8   :  { %691 = vst.msk [vmem:[%s1782_s10 + $0x30] sm:$0xff] %vm105_vm0, %v621_v52 }
 0x1d9   :  { %881 = vst.msk [vmem:[%s1783_s11 + $0x30] sm:$0xff] %vm874_vm1, %v810_v53 }
 0x1da   :  { %v430_v54 = vpop.f32.mrf.mxu1 }
 0x1db   :  { %v431_v55 = vadd.f32 %v1391_v8, %v430_v54 }
 0x1dc   :  { %v622_v38 = vpop.f32.mrf.mxu2  ;;  %v811_v56 = vpop.f32.mrf.mxu3 }
 0x1dd   :  { %v473_v57 = vmax.f32 %v431_v55, 0.0  ;;  %v623_v58 = vadd.f32 %v1428_v62, %v622_v38  ;;  %v812_v59 = vadd.f32 %v1433_v63, %v811_v56 }
 0x1df   :  { %505 = vst [vmem:[#allocation2 + $0xc8] sm:$0xff] %v473_v57  ;;  %v524_v60 = vpack.c.bf16 %v473_v57, %v472_v51 }
 0x1e0   :  { %692 = vst.msk [vmem:[%s1782_s10 + $0x38] sm:$0xff] %vm105_vm0, %v623_v58 }
 0x1e1   :  { %882 = vst.msk [vmem:[%s1783_s11 + $0x38] sm:$0xff] %vm874_vm1, %v812_v59  ;;  %664 = vmatmul.bf16.gmra.mxu2 %v524_v60  ;;  %853 = vmatmul.bf16.gmra.mxu3 %v524_v60 }
 0x1e2   :  { %v433_v61 = vpop.f32.mrf.mxu1 }
 0x1e3   :  { %v434_v0 = vadd.f32 %v1391_v8, %v433_v61 }
 0x1e4   :  { %v625_v1 = vpop.f32.mrf.mxu2  ;;  %v814_v2 = vpop.f32.mrf.mxu3 }
 0x1e5   :  { %v474_v3 = vmax.f32 %v434_v0, 0.0  ;;  %v626_v4 = vadd.f32 %v1428_v62, %v625_v1  ;;  %v815_v5 = vadd.f32 %v1433_v63, %v814_v2 }
 0x1e7   :  { %506 = vst [vmem:[#allocation2 + $0xd0] sm:$0xff] %v474_v3 }
 0x1e8   :  { %693 = vst.msk [vmem:[%s1782_s10 + $0x40] sm:$0xff] %vm105_vm0, %v626_v4 }
 0x1e9   :  { %883 = vst.msk [vmem:[%s1783_s11 + $0x40] sm:$0xff] %vm874_vm1, %v815_v5 }
 0x1ea   :  { %v435_v6 = vpop.f32.mrf.mxu1 }
 0x1eb   :  { %v436_v7 = vadd.f32 %v1391_v8, %v435_v6 }
 0x1ec   :  { %v627_v9 = vpop.f32.mrf.mxu2  ;;  %v816_v10 = vpop.f32.mrf.mxu3 }
 0x1ed   :  { %v475_v11 = vmax.f32 %v436_v7, 0.0  ;;  %v628_v12 = vadd.f32 %v1428_v62, %v627_v9  ;;  %v817_v13 = vadd.f32 %v1433_v63, %v816_v10 }
 0x1ef   :  { %507 = vst [vmem:[#allocation2 + $0xd8] sm:$0xff] %v475_v11  ;;  %v525_v14 = vpack.c.bf16 %v475_v11, %v474_v3 }
 0x1f0   :  { %694 = vst.msk [vmem:[%s1782_s10 + $0x48] sm:$0xff] %vm105_vm0, %v628_v12 }
 0x1f1   :  { %884 = vst.msk [vmem:[%s1783_s11 + $0x48] sm:$0xff] %vm874_vm1, %v817_v13  ;;  %669 = vmatmul.bf16.gmra.mxu2 %v525_v14  ;;  %858 = vmatmul.bf16.gmra.mxu3 %v525_v14 }
 0x1f2   :  { %v438_v15 = vpop.f32.mrf.mxu1 }
 0x1f3   :  { %v439_v16 = vadd.f32 %v1391_v8, %v438_v15 }
 0x1f4   :  { %v630_v17 = vpop.f32.mrf.mxu2  ;;  %v819_v18 = vpop.f32.mrf.mxu3 }
 0x1f5   :  { %v476_v19 = vmax.f32 %v439_v16, 0.0  ;;  %v631_v20 = vadd.f32 %v1428_v62, %v630_v17  ;;  %v820_v21 = vadd.f32 %v1433_v63, %v819_v18 }
 0x1f7   :  { %508 = vst [vmem:[#allocation2 + $0xe0] sm:$0xff] %v476_v19 }
 0x1f8   :  { %695 = vst.msk [vmem:[%s1782_s10 + $0x50] sm:$0xff] %vm105_vm0, %v631_v20 }
 0x1f9   :  { %885 = vst.msk [vmem:[%s1783_s11 + $0x50] sm:$0xff] %vm874_vm1, %v820_v21 }
 0x1fa   :  { %v440_v22 = vpop.f32.mrf.mxu1 }
 0x1fb   :  { %v441_v23 = vadd.f32 %v1391_v8, %v440_v22 }
 0x1fc   :  { %v632_v24 = vpop.f32.mrf.mxu2  ;;  %v821_v25 = vpop.f32.mrf.mxu3 }
 0x1fd   :  { %v477_v26 = vmax.f32 %v441_v23, 0.0  ;;  %v633_v27 = vadd.f32 %v1428_v62, %v632_v24  ;;  %v822_v28 = vadd.f32 %v1433_v63, %v821_v25 }
 0x1ff   :  { %509 = vst [vmem:[#allocation2 + $0xe8] sm:$0xff] %v477_v26  ;;  %v526_v29 = vpack.c.bf16 %v477_v26, %v476_v19 }
 0x200   :  { %696 = vst.msk [vmem:[%s1782_s10 + $0x58] sm:$0xff] %vm105_vm0, %v633_v27 }
 0x201   :  { %886 = vst.msk [vmem:[%s1783_s11 + $0x58] sm:$0xff] %vm874_vm1, %v822_v28  ;;  %674 = vmatmul.bf16.gmra.mxu2 %v526_v29  ;;  %863 = vmatmul.bf16.gmra.mxu3 %v526_v29 }
 0x202   :  { %v443_v30 = vpop.f32.mrf.mxu1 }
 0x203   :  { %v444_v31 = vadd.f32 %v1391_v8, %v443_v30 }
 0x204   :  { %v635_v32 = vpop.f32.mrf.mxu2  ;;  %v824_v33 = vpop.f32.mrf.mxu3 }
 0x205   :  { %v478_v34 = vmax.f32 %v444_v31, 0.0  ;;  %v636_v35 = vadd.f32 %v1428_v62, %v635_v32  ;;  %v825_v36 = vadd.f32 %v1433_v63, %v824_v33 }
 0x207   :  { %510 = vst [vmem:[#allocation2 + $0xf0] sm:$0xff] %v478_v34 }
 0x208   :  { %697 = vst.msk [vmem:[%s1782_s10 + $0x60] sm:$0xff] %vm105_vm0, %v636_v35 }
 0x209   :  { %887 = vst.msk [vmem:[%s1783_s11 + $0x60] sm:$0xff] %vm874_vm1, %v825_v36 }
 0x20a   :  { %v445_v37 = vpop.f32.mrf.mxu1 }
 0x20b   :  { %v446_v39 = vadd.f32 %v1391_v8, %v445_v37 }
 0x20c   :  { %v637_v40 = vpop.f32.mrf.mxu2  ;;  %v826_v41 = vpop.f32.mrf.mxu3 }
 0x20d   :  { %v479_v42 = vmax.f32 %v446_v39, 0.0  ;;  %v638_v43 = vadd.f32 %v1428_v62, %v637_v40  ;;  %v827_v44 = vadd.f32 %v1433_v63, %v826_v41 }
 0x20f   :  { %511 = vst [vmem:[#allocation2 + $0xf8] sm:$0xff] %v479_v42  ;;  %v527_v45 = vpack.c.bf16 %v479_v42, %v478_v34 }
 0x210   :  { %698 = vst.msk [vmem:[%s1782_s10 + $0x68] sm:$0xff] %vm105_vm0, %v638_v43 }
 0x211   :  { %888 = vst.msk [vmem:[%s1783_s11 + $0x68] sm:$0xff] %vm874_vm1, %v827_v44  ;;  %679 = vmatmul.bf16.gmra.mxu2 %v527_v45  ;;  %868 = vmatmul.bf16.gmra.mxu3 %v527_v45 }
 0x212   :  { %919 = dma.vmem_to_hbm [thread:$0]  %s912_s15, 4096, %s914_s2, [#allocation3], %s1113_s20, %s1113_s20, %s1114_s21  }
 0x214   :  { %v640_v8 = vpop.f32.mrf.mxu2  ;;  %v829_v46 = vpop.f32.mrf.mxu3 }
 0x215   :  { %v641_v47 = vadd.f32 %v1428_v62, %v640_v8  ;;  %v830_v48 = vadd.f32 %v1433_v63, %v829_v46 }
 0x217   :  { %699 = vst.msk [vmem:[%s1782_s10 + $0x70] sm:$0xff] %vm105_vm0, %v641_v47 }
 0x218   :  { %889 = vst.msk [vmem:[%s1783_s11 + $0x70] sm:$0xff] %vm874_vm1, %v830_v48 }
 0x21c   :  { %v642_v49 = vpop.f32.mrf.mxu2  ;;  %v831_v50 = vpop.f32.mrf.mxu3 }
 0x21d   :  { %v643_v51 = vadd.f32 %v1428_v62, %v642_v49  ;;  %v832_v52 = vadd.f32 %v1433_v63, %v831_v50 }
 0x21f   :  { %700 = vst.msk [vmem:[%s1782_s10 + $0x78] sm:$0xff] %vm105_vm0, %v643_v51 }
 0x220   :  { %890 = vst.msk [vmem:[%s1783_s11 + $0x78] sm:$0xff] %vm874_vm1, %v832_v52 }
 0x224   :  { %v645_v53 = vpop.f32.mrf.mxu2  ;;  %v834_v54 = vpop.f32.mrf.mxu3 }
 0x225   :  { %v646_v55 = vadd.f32 %v1428_v62, %v645_v53  ;;  %v835_v38 = vadd.f32 %v1433_v63, %v834_v54 }
 0x227   :  { %701 = vst.msk [vmem:[%s1782_s10 + $0x80] sm:$0xff] %vm105_vm0, %v646_v55 }
 0x228   :  { %891 = vst.msk [vmem:[%s1783_s11 + $0x80] sm:$0xff] %vm874_vm1, %v835_v38 }
 0x22c   :  { %v647_v56 = vpop.f32.mrf.mxu2  ;;  %v836_v57 = vpop.f32.mrf.mxu3 }
 0x22d   :  { %v648_v58 = vadd.f32 %v1428_v62, %v647_v56  ;;  %v837_v59 = vadd.f32 %v1433_v63, %v836_v57 }
 0x22f   :  { %702 = vst.msk [vmem:[%s1782_s10 + $0x88] sm:$0xff] %vm105_vm0, %v648_v58 }
 0x230   :  { %892 = vst.msk [vmem:[%s1783_s11 + $0x88] sm:$0xff] %vm874_vm1, %v837_v59 }
 0x234   :  { %v650_v60 = vpop.f32.mrf.mxu2  ;;  %v839_v61 = vpop.f32.mrf.mxu3 }
 0x235   :  { %v651_v0 = vadd.f32 %v1428_v62, %v650_v60  ;;  %v840_v1 = vadd.f32 %v1433_v63, %v839_v61 }
 0x237   :  { %703 = vst.msk [vmem:[%s1782_s10 + $0x90] sm:$0xff] %vm105_vm0, %v651_v0 }
 0x238   :  { %893 = vst.msk [vmem:[%s1783_s11 + $0x90] sm:$0xff] %vm874_vm1, %v840_v1 }
 0x23c   :  { %v652_v2 = vpop.f32.mrf.mxu2  ;;  %v841_v3 = vpop.f32.mrf.mxu3 }
 0x23d   :  { %v653_v4 = vadd.f32 %v1428_v62, %v652_v2  ;;  %v842_v5 = vadd.f32 %v1433_v63, %v841_v3 }
 0x23f   :  { %704 = vst.msk [vmem:[%s1782_s10 + $0x98] sm:$0xff] %vm105_vm0, %v653_v4 }
 0x240   :  { %894 = vst.msk [vmem:[%s1783_s11 + $0x98] sm:$0xff] %vm874_vm1, %v842_v5 }
 0x244   :  { %v655_v6 = vpop.f32.mrf.mxu2  ;;  %v844_v7 = vpop.f32.mrf.mxu3 }
 0x245   :  { %v656_v9 = vadd.f32 %v1428_v62, %v655_v6  ;;  %v845_v10 = vadd.f32 %v1433_v63, %v844_v7 }
 0x247   :  { %705 = vst.msk [vmem:[%s1782_s10 + $0xa0] sm:$0xff] %vm105_vm0, %v656_v9 }
 0x248   :  { %895 = vst.msk [vmem:[%s1783_s11 + $0xa0] sm:$0xff] %vm874_vm1, %v845_v10 }
 0x24c   :  { %v657_v11 = vpop.f32.mrf.mxu2  ;;  %v846_v12 = vpop.f32.mrf.mxu3 }
 0x24d   :  { %v658_v13 = vadd.f32 %v1428_v62, %v657_v11  ;;  %v847_v14 = vadd.f32 %v1433_v63, %v846_v12 }
 0x24f   :  { %706 = vst.msk [vmem:[%s1782_s10 + $0xa8] sm:$0xff] %vm105_vm0, %v658_v13 }
 0x250   :  { %896 = vst.msk [vmem:[%s1783_s11 + $0xa8] sm:$0xff] %vm874_vm1, %v847_v14 }
 0x254   :  { %v660_v15 = vpop.f32.mrf.mxu2  ;;  %v849_v16 = vpop.f32.mrf.mxu3 }
 0x255   :  { %v661_v17 = vadd.f32 %v1428_v62, %v660_v15  ;;  %v850_v18 = vadd.f32 %v1433_v63, %v849_v16 }
 0x257   :  { %707 = vst.msk [vmem:[%s1782_s10 + $0xb0] sm:$0xff] %vm105_vm0, %v661_v17 }
 0x258   :  { %897 = vst.msk [vmem:[%s1783_s11 + $0xb0] sm:$0xff] %vm874_vm1, %v850_v18 }
 0x25c   :  { %v662_v19 = vpop.f32.mrf.mxu2  ;;  %v851_v20 = vpop.f32.mrf.mxu3 }
 0x25d   :  { %v663_v21 = vadd.f32 %v1428_v62, %v662_v19  ;;  %v852_v22 = vadd.f32 %v1433_v63, %v851_v20 }
 0x25f   :  { %708 = vst.msk [vmem:[%s1782_s10 + $0xb8] sm:$0xff] %vm105_vm0, %v663_v21 }
 0x260   :  { %898 = vst.msk [vmem:[%s1783_s11 + $0xb8] sm:$0xff] %vm874_vm1, %v852_v22 }
 0x264   :  { %v665_v23 = vpop.f32.mrf.mxu2  ;;  %v854_v24 = vpop.f32.mrf.mxu3 }
 0x265   :  { %v666_v25 = vadd.f32 %v1428_v62, %v665_v23  ;;  %v855_v26 = vadd.f32 %v1433_v63, %v854_v24 }
 0x267   :  { %709 = vst.msk [vmem:[%s1782_s10 + $0xc0] sm:$0xff] %vm105_vm0, %v666_v25 }
 0x268   :  { %899 = vst.msk [vmem:[%s1783_s11 + $0xc0] sm:$0xff] %vm874_vm1, %v855_v26 }
 0x26c   :  { %v667_v27 = vpop.f32.mrf.mxu2  ;;  %v856_v28 = vpop.f32.mrf.mxu3 }
 0x26d   :  { %v668_v29 = vadd.f32 %v1428_v62, %v667_v27  ;;  %v857_v30 = vadd.f32 %v1433_v63, %v856_v28 }
 0x26f   :  { %710 = vst.msk [vmem:[%s1782_s10 + $0xc8] sm:$0xff] %vm105_vm0, %v668_v29 }
 0x270   :  { %900 = vst.msk [vmem:[%s1783_s11 + $0xc8] sm:$0xff] %vm874_vm1, %v857_v30 }
 0x274   :  { %v670_v31 = vpop.f32.mrf.mxu2  ;;  %v859_v32 = vpop.f32.mrf.mxu3 }
 0x275   :  { %v671_v33 = vadd.f32 %v1428_v62, %v670_v31  ;;  %v860_v34 = vadd.f32 %v1433_v63, %v859_v32 }
 0x277   :  { %711 = vst.msk [vmem:[%s1782_s10 + $0xd0] sm:$0xff] %vm105_vm0, %v671_v33 }
 0x278   :  { %901 = vst.msk [vmem:[%s1783_s11 + $0xd0] sm:$0xff] %vm874_vm1, %v860_v34 }
 0x27c   :  { %v672_v35 = vpop.f32.mrf.mxu2  ;;  %v861_v36 = vpop.f32.mrf.mxu3 }
 0x27d   :  { %v673_v37 = vadd.f32 %v1428_v62, %v672_v35  ;;  %v862_v39 = vadd.f32 %v1433_v63, %v861_v36 }
 0x27f   :  { %712 = vst.msk [vmem:[%s1782_s10 + $0xd8] sm:$0xff] %vm105_vm0, %v673_v37 }
 0x280   :  { %902 = vst.msk [vmem:[%s1783_s11 + $0xd8] sm:$0xff] %vm874_vm1, %v862_v39 }
 0x284   :  { %v675_v40 = vpop.f32.mrf.mxu2  ;;  %v864_v41 = vpop.f32.mrf.mxu3 }
 0x285   :  { %v676_v42 = vadd.f32 %v1428_v62, %v675_v40  ;;  %v865_v43 = vadd.f32 %v1433_v63, %v864_v41 }
 0x287   :  { %713 = vst.msk [vmem:[%s1782_s10 + $0xe0] sm:$0xff] %vm105_vm0, %v676_v42 }
 0x288   :  { %903 = vst.msk [vmem:[%s1783_s11 + $0xe0] sm:$0xff] %vm874_vm1, %v865_v43 }
 0x28c   :  { %v677_v44 = vpop.f32.mrf.mxu2  ;;  %v866_v45 = vpop.f32.mrf.mxu3 }
 0x28d   :  { %v678_v8 = vadd.f32 %v1428_v62, %v677_v44  ;;  %v867_v46 = vadd.f32 %v1433_v63, %v866_v45 }
 0x28f   :  { %714 = vst.msk [vmem:[%s1782_s10 + $0xe8] sm:$0xff] %vm105_vm0, %v678_v8 }
 0x290   :  { %904 = vst.msk [vmem:[%s1783_s11 + $0xe8] sm:$0xff] %vm874_vm1, %v867_v46 }
 0x294   :  { %v680_v47 = vpop.f32.mrf.mxu2  ;;  %v869_v48 = vpop.f32.mrf.mxu3 }
 0x295   :  { %v681_v49 = vadd.f32 %v1428_v62, %v680_v47  ;;  %v870_v50 = vadd.f32 %v1433_v63, %v869_v48 }
 0x297   :  { %715 = vst.msk [vmem:[%s1782_s10 + $0xf0] sm:$0xff] %vm105_vm0, %v681_v49 }
 0x298   :  { %905 = vst.msk [vmem:[%s1783_s11 + $0xf0] sm:$0xff] %vm874_vm1, %v870_v50 }
 0x29c   :  { %v682_v51 = vpop.f32.mrf.mxu2  ;;  %v871_v52 = vpop.f32.mrf.mxu3 }
 0x29d   :  { %v683_v53 = vadd.f32 %v1428_v62, %v682_v51  ;;  %v872_v54 = vadd.f32 %v1433_v63, %v871_v52 }
 0x29f   :  { %716 = vst.msk [vmem:[%s1782_s10 + $0xf8] sm:$0xff] %vm105_vm0, %v683_v53 }
 0x2a0   :  { %906 = vst.msk [vmem:[%s1783_s11 + $0xf8] sm:$0xff] %vm874_vm1, %v872_v54 }
 0x2a1   :  { %1110 = dma.done.wait [#allocation3], 4096  }
 0x2a2   :  { %1111 = vsyncadd [#allocation3], 4294963200 }
 0x2a3   :  { %932 = vsyncpa [#allocation3], 1 }

</bundles_post_ra>
